<compile_context>
chip_gen: v7x
topology: tpu7x:2x2x1
jax: 0.10.0
libtpu: 0.0.40
codegen_flags: <defaults>
</compile_context>

<pallas_src>
import jax
import jax.numpy as jnp
from jax.experimental import pallas as pl
from jax.experimental.pallas import tpu as pltpu


_VMEM_LIMIT_BYTES = 32 * 1024 * 1024    # safe scoped VMEM limit on v5e/v6e/v7x
_BLOCK_BUDGET_BYTES = 2 * 1024 * 1024   # per-block target (x2 for double buffering)


# ----------------------------- kernels ------------------------------------ #

def _bn_stats_kernel(x_ref, sum_ref, sumsq_ref):
    """Accumulate per-channel sum / sum-of-squares. Channel axis is axis 1.

    Works for both 2D tiles (TM, C) and 3D tiles (TN, C, THW); the stat
    accumulators are output blocks that stay VMEM-resident across the grid.
    """
    @pl.when(jnp.logical_and(pl.program_id(0) == 0, pl.program_id(1) == 0))
    def _init():
        sum_ref[...] = jnp.zeros_like(sum_ref)
        sumsq_ref[...] = jnp.zeros_like(sumsq_ref)

    x = x_ref[...].astype(jnp.float32)
    axes = tuple(a for a in range(x.ndim) if a != 1)
    sum_ref[...] += jnp.sum(x, axis=axes, keepdims=True)
    sumsq_ref[...] += jnp.sum(x * x, axis=axes, keepdims=True)


def _bn_norm_kernel(x_ref, scale_ref, bias_ref, y_ref):
    """y = x * scale + bias  (scale/bias already fold gamma, beta, mean, inv_std)."""
    x = x_ref[...].astype(jnp.float32)
    y_ref[...] = (x * scale_ref[...] + bias_ref[...]).astype(y_ref.dtype)


# ----------------------------- tiling helper ------------------------------ #

def _largest_divisor(n, cap, multiple_of=1):
    """Largest d with d | n, d <= cap, d % multiple_of == 0; fallback n (full axis)."""
    cap = max(multiple_of, min(int(cap), n))
    start = (cap // multiple_of) * multiple_of
    for d in range(start, 0, -multiple_of):
        if n % d == 0:
            return d
    return n


# ----------------------------- host wrappers ------------------------------ #

def _bn_train_pallas_3d(x3, gamma, beta, eps):
    """x3: (N, C, HW). Returns (y3, mean, var) with mean/var shaped (1, C, 1) f32."""
    N, C, HW = x3.shape
    itemsize = jnp.dtype(x3.dtype).itemsize
    M = N * HW

    slab_bytes = C * HW * itemsize
    if slab_bytes <= _BLOCK_BUDGET_BYTES:
        thw = HW
        tn = _largest_divisor(N, _BLOCK_BUDGET_BYTES // slab_bytes)
    else:
        tn = 1
        thw = _largest_divisor(HW, _BLOCK_BUDGET_BYTES // (C * itemsize),
                               multiple_of=128)
    grid = (N // tn, HW // thw)

    x_spec = pl.BlockSpec((tn, C, thw), lambda i, j: (i, 0, j))
    stat_spec = pl.BlockSpec((1, C, 1), lambda i, j: (0, 0, 0))

    # Pass 1: per-channel sum and sum-of-squares (single streaming read of x).
    s, ss = pl.pallas_call(
        _bn_stats_kernel,
        grid=grid,
        in_specs=[x_spec],
        out_specs=(stat_spec, stat_spec),
        out_shape=(jax.ShapeDtypeStruct((1, C, 1), jnp.float32),
                   jax.ShapeDtypeStruct((1, C, 1), jnp.float32)),
        compiler_params=pltpu.CompilerParams(
            dimension_semantics=("arbitrary", "arbitrary"),
            vmem_limit_bytes=_VMEM_LIMIT_BYTES),
    )(x3)

    mean = s / M
    var = jnp.maximum(ss / M - mean * mean, 0.0)     # biased var (matches module)
    inv_std = jax.lax.rsqrt(var + eps)
    scale = gamma.reshape(1, C, 1).astype(jnp.float32) * inv_std
    bias = beta.reshape(1, C, 1).astype(jnp.float32) - mean * scale

    # Pass 2: normalize.  Fully parallel grid -> megacore-shardable on v7x.
    y3 = pl.pallas_call(
        _bn_norm_kernel,
        grid=grid,
        in_specs=[x_spec, stat_spec, stat_spec],
        out_specs=x_spec,
        out_shape=jax.ShapeDtypeStruct((N, C, HW), x3.dtype),
        compiler_params=pltpu.CompilerParams(
            dimension_semantics=("parallel", "parallel"),
            vmem_limit_bytes=_VMEM_LIMIT_BYTES),
    )(x3, scale, bias)
    return y3, mean, var


def _bn_train_pallas_2d(x2, gamma, beta, eps):
    """x2: (N, C). Returns (y2, mean, var) with mean/var shaped (1, C) f32."""
    N, C = x2.shape
    itemsize = jnp.dtype(x2.dtype).itemsize
    row_bytes = C * itemsize
    tm = _largest_divisor(N, max(8, _BLOCK_BUDGET_BYTES // row_bytes), multiple_of=8)
    grid = (N // tm, 1)

    x_spec = pl.BlockSpec((tm, C), lambda i, j: (i, 0))
    stat_spec = pl.BlockSpec((1, C), lambda i, j: (0, 0))

    s, ss = pl.pallas_call(
        _bn_stats_kernel,
        grid=grid,
        in_specs=[x_spec],
        out_specs=(stat_spec, stat_spec),
        out_shape=(jax.ShapeDtypeStruct((1, C), jnp.float32),
                   jax.ShapeDtypeStruct((1, C), jnp.float32)),
        compiler_params=pltpu.CompilerParams(
            dimension_semantics=("arbitrary", "arbitrary"),
            vmem_limit_bytes=_VMEM_LIMIT_BYTES),
    )(x2)

    mean = s / N
    var = jnp.maximum(ss / N - mean * mean, 0.0)
    inv_std = jax.lax.rsqrt(var + eps)
    scale = gamma.reshape(1, C).astype(jnp.float32) * inv_std
    bias = beta.reshape(1, C).astype(jnp.float32) - mean * scale

    y2 = pl.pallas_call(
        _bn_norm_kernel,
        grid=grid,
        in_specs=[x_spec, stat_spec, stat_spec],
        out_specs=x_spec,
        out_shape=jax.ShapeDtypeStruct((N, C), x2.dtype),
        compiler_params=pltpu.CompilerParams(
            dimension_semantics=("parallel", "parallel"),
            vmem_limit_bytes=_VMEM_LIMIT_BYTES),
    )(x2, scale, bias)
    return y2, mean, var


def batch_norm_pallas(x, gamma, beta, moving_mean, moving_var,
                      eps=1e-5, momentum=0.9):
    """Training-mode batch norm forward. Supports 2D (N, C) and 4D NCHW input.

    Note: this intentionally reproduces the reference module's conventions
    (biased batch variance in the running stats, running = m*running + (1-m)*batch),
    which differ from torch.nn.BatchNorm2d.
    """
    assert x.ndim in (2, 4)
    if x.ndim == 4:
        N, C, H, W = x.shape
        x3 = x.reshape(N, C, H * W)          # metadata-only reshape, no transpose
        y3, mean, var = _bn_train_pallas_3d(x3, gamma, beta, eps)
        y = y3.reshape(N, C, H, W)
        mean_p = mean.reshape(1, C, 1, 1)
        var_p = var.reshape(1, C, 1, 1)
    else:
        N, C = x.shape
        y, mean, var = _bn_train_pallas_2d(x, gamma, beta, eps)
        mean_p = mean.reshape(1, C)
        var_p = var.reshape(1, C)

    new_mm = momentum * moving_mean + (1.0 - momentum) * mean_p.astype(moving_mean.dtype)
    new_mv = momentum * moving_var + (1.0 - momentum) * var_p.astype(moving_var.dtype)
    return y, new_mm, new_mv


class BatchNormPallas:
    """Mirror of the PyTorch BatchNorm module (deterministic init, training path)."""

    def __init__(self, num_features, num_dims):
        shape = (1, num_features) if num_dims == 2 else (1, num_features, 1, 1)
        self.gamma = jnp.ones(shape, jnp.float32)
        self.beta = jnp.zeros(shape, jnp.float32)
        self.moving_mean = jnp.zeros(shape, jnp.float32)
        self.moving_var = jnp.ones(shape, jnp.float32)

    def __call__(self, x):
        # The PyTorch forward takes the training branch whenever autograd is
        # enabled (the default); we reproduce that path.
        y, self.moving_mean, self.moving_var = batch_norm_pallas(
            x, self.gamma, self.beta, self.moving_mean, self.moving_var,
            eps=1e-5, momentum=0.9)
        return y


if __name__ == "__main__":
    key = jax.random.PRNGKey(0)
    k4, k2 = jax.random.split(key)

    # --- 4D NCHW path (conv-style BatchNorm) ---
    x = jax.random.normal(k4, (2, 4, 16, 16), dtype=jnp.float32)
    bn = BatchNormPallas(num_features=4, num_dims=4)
    y = bn(x)
    jax.block_until_ready(y)
    jax.block_until_ready(bn.moving_mean)
    jax.block_until_ready(bn.moving_var)

    mean_ref = x.mean(axis=(0, 2, 3), keepdims=True)
    var_ref = ((x - mean_ref) ** 2).mean(axis=(0, 2, 3), keepdims=True)
    y_ref = (x - mean_ref) / jnp.sqrt(var_ref + 1e-5)   # gamma=1, beta=0
    assert jnp.allclose(y, y_ref, atol=1e-4, rtol=1e-4)
    assert jnp.allclose(bn.moving_mean, 0.1 * mean_ref, atol=1e-5)
    assert jnp.allclose(bn.moving_var, 0.9 + 0.1 * var_ref, atol=1e-5)

    # --- 2D (N, C) path (fully-connected BatchNorm) ---
    x2 = jax.random.normal(k2, (8, 4), dtype=jnp.float32)
    bn2 = BatchNormPallas(num_features=4, num_dims=2)
    y2 = bn2(x2)
    jax.block_until_ready(y2)

    mean2_ref = x2.mean(axis=0, keepdims=True)
    var2_ref = ((x2 - mean2_ref) ** 2).mean(axis=0, keepdims=True)
    y2_ref = (x2 - mean2_ref) / jnp.sqrt(var2_ref + 1e-5)
    assert jnp.allclose(y2, y2_ref, atol=1e-4, rtol=1e-4)

    print("KERNEL_OK")
</pallas_src>

<mosaic_0001>
module attributes {stable_mosaic.version = 11 : i64} {
  func.func @_bn_stats_kernel(%arg0: i32, %arg1: i32, %arg2: memref<2x4x256xf32, #tpu.memory_space<vmem>>, %arg3: memref<1x4x1xf32, #tpu.memory_space<vmem>>, %arg4: memref<1x4x1xf32, #tpu.memory_space<vmem>>) attributes {dimension_semantics = [#tpu.dimension_semantics<arbitrary>, #tpu.dimension_semantics<arbitrary>], iteration_bounds = array<i64: 1, 1>, scalar_prefetch = 0 : i64, scratch_operands = 0 : i64, tpu.core_type = #tpu.core_type<tc>, window_params = [{transform_indices = @transform_0, window_bounds = array<i64: 2, 4, 256>}, {pipeline_mode = #tpu.pipeline_mode<synchronous>, transform_indices = @transform_1, window_bounds = array<i64: 1, 4, 1>}, {pipeline_mode = #tpu.pipeline_mode<synchronous>, transform_indices = @transform_2, window_bounds = array<i64: 1, 4, 1>}]} {
    %c0_i32 = arith.constant 0 : i32
    %0 = arith.cmpi eq, %arg0, %c0_i32 : i32
    %c0_i32_0 = arith.constant 0 : i32
    %1 = arith.cmpi eq, %arg1, %c0_i32_0 : i32
    %2 = arith.andi %0, %1 : i1
    %3 = arith.extui %2 : i1 to i32
    %c0_i32_1 = arith.constant 0 : i32
    %4 = arith.cmpi ne, %3, %c0_i32_1 : i32
    scf.if %4 {
      %cst_17 = arith.constant 0.000000e+00 : f32
      %17 = vector.broadcast %cst_17 : f32 to vector<1x4x1xf32>
      %c0_18 = arith.constant 0 : index
      %c0_19 = arith.constant 0 : index
      %c0_20 = arith.constant 0 : index
      %18 = vector.load %arg3[%c0_18, %c0_19, %c0_20] : memref<1x4x1xf32, #tpu.memory_space<vmem>>, vector<1x4x1xf32>
      tpu.vector_store %arg3[%c0_18, %c0_19, %c0_20], %17 {strides = array<i32>} : memref<1x4x1xf32, #tpu.memory_space<vmem>>, vector<1x4x1xf32>,
      %cst_21 = arith.constant 0.000000e+00 : f32
      %19 = vector.broadcast %cst_21 : f32 to vector<1x4x1xf32>
      %c0_22 = arith.constant 0 : index
      %c0_23 = arith.constant 0 : index
      %c0_24 = arith.constant 0 : index
      %20 = vector.load %arg4[%c0_22, %c0_23, %c0_24] : memref<1x4x1xf32, #tpu.memory_space<vmem>>, vector<1x4x1xf32>
      tpu.vector_store %arg4[%c0_22, %c0_23, %c0_24], %19 {strides = array<i32>} : memref<1x4x1xf32, #tpu.memory_space<vmem>>, vector<1x4x1xf32>,
    } else {
    }
    %c0 = arith.constant 0 : index
    %c0_2 = arith.constant 0 : index
    %c0_3 = arith.constant 0 : index
    %5 = vector.load %arg2[%c0, %c0_2, %c0_3] : memref<2x4x256xf32, #tpu.memory_space<vmem>>, vector<2x4x256xf32>
    %c0_4 = arith.constant 0 : index
    %c0_5 = arith.constant 0 : index
    %c0_6 = arith.constant 0 : index
    %6 = vector.load %arg3[%c0_4, %c0_5, %c0_6] : memref<1x4x1xf32, #tpu.memory_space<vmem>>, vector<1x4x1xf32>
    %cst = arith.constant dense<0.000000e+00> : vector<4xf32>
    %7 = vector.multi_reduction <add>, %5, %cst [0, 2] : vector<2x4x256xf32> to vector<4xf32>
    %8 = vector.shape_cast %7 : vector<4xf32> to vector<1x4x1xf32>
    %9 = arith.addf %6, %8 : vector<1x4x1xf32>
    %c0_7 = arith.constant 0 : index
    %c0_8 = arith.constant 0 : index
    %c0_9 = arith.constant 0 : index
    %10 = vector.load %arg3[%c0_7, %c0_8, %c0_9] : memref<1x4x1xf32, #tpu.memory_space<vmem>>, vector<1x4x1xf32>
    tpu.vector_store %arg3[%c0_7, %c0_8, %c0_9], %9 {strides = array<i32>} : memref<1x4x1xf32, #tpu.memory_space<vmem>>, vector<1x4x1xf32>,
    %c0_10 = arith.constant 0 : index
    %c0_11 = arith.constant 0 : index
    %c0_12 = arith.constant 0 : index
    %11 = vector.load %arg4[%c0_10, %c0_11, %c0_12] : memref<1x4x1xf32, #tpu.memory_space<vmem>>, vector<1x4x1xf32>
    %12 = arith.mulf %5, %5 : vector<2x4x256xf32>
    %cst_13 = arith.constant dense<0.000000e+00> : vector<4xf32>
    %13 = vector.multi_reduction <add>, %12, %cst_13 [0, 2] : vector<2x4x256xf32> to vector<4xf32>
    %14 = vector.shape_cast %13 : vector<4xf32> to vector<1x4x1xf32>
    %15 = arith.addf %11, %14 : vector<1x4x1xf32>
    %c0_14 = arith.constant 0 : index
    %c0_15 = arith.constant 0 : index
    %c0_16 = arith.constant 0 : index
    %16 = vector.load %arg4[%c0_14, %c0_15, %c0_16] : memref<1x4x1xf32, #tpu.memory_space<vmem>>, vector<1x4x1xf32>
    tpu.vector_store %arg4[%c0_14, %c0_15, %c0_16], %15 {strides = array<i32>} : memref<1x4x1xf32, #tpu.memory_space<vmem>>, vector<1x4x1xf32>,
    return
  }
  func.func @transform_0(%arg0: i32, %arg1: i32) -> (i32, i32, i32) {
    %c0_i32 = arith.constant 0 : i32
    %c0_i32_0 = arith.constant 0 : i32
    return %arg0, %c0_i32, %arg1 : i32, i32, i32
  }
  func.func @transform_1(%arg0: i32, %arg1: i32) -> (i32, i32, i32) {
    %c0_i32 = arith.constant 0 : i32
    %c0_i32_0 = arith.constant 0 : i32
    %c0_i32_1 = arith.constant 0 : i32
    %c0_i32_2 = arith.constant 0 : i32
    return %c0_i32, %c0_i32_0, %c0_i32_1 : i32, i32, i32
  }
  func.func @transform_2(%arg0: i32, %arg1: i32) -> (i32, i32, i32) {
    %c0_i32 = arith.constant 0 : i32
    %c0_i32_0 = arith.constant 0 : i32
    %c0_i32_1 = arith.constant 0 : i32
    %c0_i32_2 = arith.constant 0 : i32
    return %c0_i32, %c0_i32_0, %c0_i32_1 : i32, i32, i32
  }
}

</mosaic_0001>

<bundles_post_ra>
// kernel: tpu_custom_call.1
= control target key start
LH: loop header
LB: loop body
LE: loop exit
PB: predicated region body
PF: predicated region fallthrough
CT: control target
= control target key end

     0   :  { %8 = vsyncpa [#allocation3], 0  ;;  %s114_s9 = smov [#allocation2]   ;;  %s175_s0 = inlined_call_operand.hbm [shape: f32[2,4,256], index: 0, kind: input, shape index: {}]   ;;  %s176_s1 = inlined_call_operand.vmem [shape: f32[1,4,1], index: 1, kind: output, shape index: {0}]   ;;  %s177_s2 = inlined_call_operand.vmem [shape: f32[1,4,1], index: 2, kind: output, shape index: {1}]  }
   0x1   :  { %s14_s10 = sshll.u32 %s114_s9, 4  ;;  %s90_s13 = scalar_lea.hbm %s175_s0, 256  ;;  %s15_s10 = int_to_ptr.vmem [resolvable:$true] %s14_s10 }
   0x2   :  { %p91_p0 = scmp.ne.s32.totalorder %s175_s0, %s90_s13  ;;  %p94_p1 = scmp.lt.u32.totalorder %s90_s13, %s175_s0 }
   0x4   :  { %p96_p2 = pnand %p94_p1, %p91_p0 }
   0x6   :  { %99 = shalt.err (!%p96_p2)
}
   0x7   :  { %s100_s18 = scalar_lea.vmem %s15_s10, 256  ;;  %p105_p4 = scmp.lt.s32.totalorder %s15_s10, %s15_s10 }
   0x8   :  { %p101_p3 = scmp.ne.s32.totalorder %s15_s10, %s100_s18  ;;  %p106_p5 = scmp.lt.s32.totalorder %s100_s18, %s100_s18 }
   0xa   :  { %p107_p6 = por %p106_p5, %p105_p4 }
   0xc   :  { %p108_p7 = pnand %p107_p6, %p101_p3 }
   0xe   :  { %111 = shalt.err (!%p108_p7)
}
   0xf   :  { %s115_s19 = smov 128   ;;  %s116_s20 = smov 8  }
  0x10   :  { %20 = dma.hbm_to_vmem [thread:$0]  %s175_s0, 256, %s15_s10, [#allocation3], %s115_s19, %s115_s19, %s116_s20  }
  0x11   :  { %112 = dma.done.wait [#allocation3], 256  }
  0x12   :  { %113 = vsyncadd [#allocation3], 4294967040  ;;  %vm30_vm0 = vcmask 3072   ;;  %v117_v0 = vmov 0.0   ;;  %vm42_vm1 = vcmask 1043456   ;;  %v33_v1 = vld [vmem:[#allocation2] sm:$0xff] }
  0x13   :  { %31 = vst.msk [vmem:[%s176_s1] sm:$0xf] %vm30_vm0, %v117_v0  ;;  %32 = vst.msk [vmem:[%s177_s2] sm:$0xf] %vm30_vm0, %v117_v0  ;;  %v34_v2 = vld [vmem:[#allocation2 + $0x8] sm:$0xff]  ;;  %v38_v3 = vcombine.high %v33_v1, %v33_v1  ;;  %v43_v5 = vsel %vm42_vm1, %v33_v1, 0.0  ;;  %v56_v6 = vmul.f32 %v33_v1, %v33_v1 }
  0x14   :  { %v39_v4 = vcombine.high %v34_v2, %v34_v2  ;;  %v57_v7 = vmul.f32 %v34_v2, %v34_v2  ;;  %v46_v9 = vsel %vm42_vm1, %v34_v2, 0.0 }
  0x15   :  { %v44_v8 = vsel %vm42_vm1, %v38_v3, 0.0  ;;  %v60_v11 = vcombine.high %v56_v6, %v56_v6  ;;  %v64_v13 = vsel %vm42_vm1, %v56_v6, 0.0 }
  0x16   :  { %v45_v10 = vadd.f32 %v44_v8, %v43_v5  ;;  %v61_v12 = vcombine.high %v57_v7, %v57_v7  ;;  %v48_v14 = vsel %vm42_vm1, %v39_v4, 0.0  ;;  %v67_v17 = vsel %vm42_vm1, %v57_v7, 0.0 }
  0x17   :  { %v65_v16 = vsel %vm42_vm1, %v60_v11, 0.0 }
  0x18   :  { %v47_v15 = vadd.f32 %v46_v9, %v45_v10  ;;  %v66_v18 = vadd.f32 %v65_v16, %v64_v13  ;;  %v69_v20 = vsel %vm42_vm1, %v61_v12, 0.0 }
  0x1a   :  { %v49_v19 = vadd.f32 %v48_v14, %v47_v15  ;;  %v68_v21 = vadd.f32 %v67_v17, %v66_v18  ;;  %v35_v23 = vld [vmem:[%s176_s1] sm:$0xf] }
  0x1b   :  { %v55_v26 = vld [vmem:[%s177_s2] sm:$0xf] }
  0x1c   :  { %50 = vadd.xlane.f32.xlu0 %v49_v19  ;;  %v70_v22 = vadd.f32 %v69_v20, %v68_v21 }
  0x20   :  { %71 = vadd.xlane.f32.xlu0 %v70_v22 }
  0xa9   :  { %v51_v24 = vpop.xlane.xlu0 %50 }
  0xaa   :  { %v52_v25 = vadd.f32 %v51_v24, %v35_v23 }
  0xac   :  { %54 = vst.msk [vmem:[%s176_s1] sm:$0xf] %vm30_vm0, %v52_v25 }
  0xad   :  { %v72_v27 = vpop.xlane.xlu0 %71 }
  0xae   :  { %v73_v28 = vadd.f32 %v72_v27, %v55_v26 }
  0xb0   :  { %74 = vst.msk [vmem:[%s177_s2] sm:$0xf] %vm30_vm0, %v73_v28 }
  0xb1   :  { %83 = vsyncpa [#allocation3], 1 }

</bundles_post_ra>
